<compile_context>
chip_gen: v5e
topology: v5e:2x2
jax: 0.10.0
libtpu: 0.0.40
codegen_flags: <defaults>
</compile_context>

<pallas_src>
import functools

import jax
import jax.numpy as jnp
from jax.experimental import pallas as pl
from jax.experimental.pallas import tpu as pltpu

_LANE = 128          # minimum lane granularity along the box-index axis
_MAX_BLOCK = 32768   # lane cap: (8+1+1 rows)*4B*32768*2 bufs ≈ 2.5 MiB VMEM


def _round_up(x, m):
    return ((x + m - 1) // m) * m


def _iou_loss_kernel(boxes_ref, w_ref, out_ref, *, mode, eps):
    # boxes_ref: (8, BLOCK) f32 -- rows [px1,py1,px2,py2,tx1,ty1,tx2,ty2]
    # static sublane slices of the Ref are free views
    px1 = boxes_ref[0:1, :]
    py1 = boxes_ref[1:2, :]
    px2 = boxes_ref[2:3, :]
    py2 = boxes_ref[3:4, :]
    tx1 = boxes_ref[4:5, :]
    ty1 = boxes_ref[5:6, :]
    tx2 = boxes_ref[6:7, :]
    ty2 = boxes_ref[7:8, :]

    # aligned bbox_overlaps (mmdet semantics)
    area_p = (px2 - px1) * (py2 - py1)
    area_t = (tx2 - tx1) * (ty2 - ty1)
    iw = jnp.maximum(jnp.minimum(px2, tx2) - jnp.maximum(px1, tx1), 0.0)
    ih = jnp.maximum(jnp.minimum(py2, ty2) - jnp.maximum(py1, ty1), 0.0)
    overlap = iw * ih
    union = jnp.maximum(area_p + area_t - overlap, eps)   # bbox_overlaps clamp
    ious = jnp.maximum(overlap / union, eps)               # iou_loss clamp(min=eps)

    if mode == "linear":
        loss = 1.0 - ious
    elif mode == "square":
        loss = 1.0 - ious * ious
    else:  # "log"
        loss = -jnp.log(ious)

    out_ref[...] = loss * w_ref[...]


def _pallas_iou_loss(boxes, w_row, mode, eps, block):
    """boxes: (8, Npad) f32; w_row: (1, Npad) f32 -> (1, Npad) f32."""
    npad = boxes.shape[1]
    kernel = functools.partial(_iou_loss_kernel, mode=mode, eps=eps)
    n_trans = npad if mode == "log" else 0
    return pl.pallas_call(
        kernel,
        out_shape=jax.ShapeDtypeStruct((1, npad), jnp.float32),
        grid_spec=pltpu.PrefetchScalarGridSpec(
            num_scalar_prefetch=0,
            grid=(npad // block,),
            in_specs=[
                pl.BlockSpec((8, block), lambda i: (0, i)),
                pl.BlockSpec((1, block), lambda i: (0, i)),
            ],
            out_specs=pl.BlockSpec((1, block), lambda i: (0, i)),
        ),
        compiler_params=pltpu.CompilerParams(
            dimension_semantics=("parallel",)),
        cost_estimate=pl.CostEstimate(
            flops=15 * npad,
            transcendentals=n_trans,
            bytes_accessed=40 * npad),   # 8 + 1 rows in, 1 row out, f32
    )(boxes, w_row)


@functools.partial(jax.jit, static_argnames=("mode", "eps"))
def _iou_loss_per_box(pred32, tgt32, w, *, mode, eps):
    """pred32/tgt32: (n, 4) f32; w: (n,) f32 -> per-box weighted loss (n,)."""
    n = pred32.shape[0]
    block = min(_round_up(n, _LANE), _MAX_BLOCK)
    npad = _round_up(n, block)
    pad = npad - n

    # one packed, tile-aligned (8, Npad) input; padded lanes get weight 0
    boxes = jnp.concatenate([pred32.T, tgt32.T], axis=0)   # (8, n)
    boxes = jnp.pad(boxes, ((0, 0), (0, pad)))
    w_row = jnp.pad(w[None, :], ((0, 0), (0, pad)))

    loss_row = _pallas_iou_loss(boxes, w_row, mode, eps, block)
    return loss_row[0, :n]


class IoULoss:
    """JAX/Pallas port of otx IoULoss (forward pass, no learnable params)."""

    def __init__(self, linear=False, eps=1e-6, reduction="mean",
                 loss_weight=1.0, mode="log"):
        assert mode in ("linear", "square", "log")
        if linear:
            mode = "linear"
        self.mode = mode
        self.eps = eps
        self.reduction = reduction
        self.loss_weight = loss_weight

    def __call__(self, pred, target, weight=None, avg_factor=None,
                 reduction_override=None):
        assert reduction_override in (None, "none", "mean", "sum")
        reduction = reduction_override if reduction_override else self.reduction

        fp16 = pred.dtype == jnp.float16
        pred32 = pred.astype(jnp.float32)
        tgt32 = target.astype(jnp.float32)
        n = pred.shape[0]

        # "all weights <= 0" early-exit scalar (traceable; selected via where)
        zero_out = None
        if weight is not None and reduction != "none":
            w0 = weight
            if pred.ndim == w0.ndim + 1:
                w0 = w0[:, None]
            zero_out = (pred32 * w0.astype(jnp.float32)).sum()
            has_pos = jnp.any(weight > 0)

        if weight is not None and weight.ndim > 1:
            assert weight.shape == pred.shape
            weight = weight.mean(-1)

        w = (jnp.ones((n,), jnp.float32) if weight is None
             else weight.astype(jnp.float32))

        # per-box, already weight-multiplied
        loss = _iou_loss_per_box(pred32, tgt32, w, mode=self.mode, eps=self.eps)

        # weight_reduce_loss semantics
        if avg_factor is None:
            if reduction == "mean":
                out = loss.sum() / n
            elif reduction == "sum":
                out = loss.sum()
            else:
                out = loss
        elif reduction == "mean":
            out = loss.sum() / (avg_factor + jnp.finfo(jnp.float32).eps)
        elif reduction == "none":
            out = loss
        else:
            raise ValueError('avg_factor can not be used with reduction="sum"')

        if zero_out is not None:
            out = jnp.where(has_pos, out, zero_out)

        if fp16:
            out = out.astype(jnp.float16)
        return self.loss_weight * out


def _reference_iou_loss(pred, target, weight=None, mode="log", eps=1e-6,
                        reduction="mean"):
    px1, py1, px2, py2 = [pred[:, i] for i in range(4)]
    tx1, ty1, tx2, ty2 = [target[:, i] for i in range(4)]
    area_p = (px2 - px1) * (py2 - py1)
    area_t = (tx2 - tx1) * (ty2 - ty1)
    iw = jnp.maximum(jnp.minimum(px2, tx2) - jnp.maximum(px1, tx1), 0.0)
    ih = jnp.maximum(jnp.minimum(py2, ty2) - jnp.maximum(py1, ty1), 0.0)
    overlap = iw * ih
    union = jnp.maximum(area_p + area_t - overlap, eps)
    ious = jnp.maximum(overlap / union, eps)
    if mode == "linear":
        loss = 1.0 - ious
    elif mode == "square":
        loss = 1.0 - ious ** 2
    else:
        loss = -jnp.log(ious)
    if weight is not None:
        loss = loss * weight
    if reduction == "mean":
        return loss.sum() / loss.shape[0]
    if reduction == "sum":
        return loss.sum()
    return loss


if __name__ == "__main__":
    key = jax.random.PRNGKey(0)
    k1, k2, k3, k4, k5 = jax.random.split(key, 5)
    n = 10  # number of boxes

    # build well-formed (x1, y1, x2, y2) boxes
    p_xy = jax.random.uniform(k1, (n, 2), jnp.float32, 0.0, 10.0)
    p_wh = jax.random.uniform(k2, (n, 2), jnp.float32, 1.0, 5.0)
    pred = jnp.concatenate([p_xy, p_xy + p_wh], axis=-1)          # (n, 4)

    t_xy = p_xy + jax.random.uniform(k3, (n, 2), jnp.float32, -1.0, 1.0)
    t_wh = p_wh + jax.random.uniform(k4, (n, 2), jnp.float32, -0.5, 0.5)
    target = jnp.concatenate([t_xy, t_xy + t_wh], axis=-1)        # (n, 4)

    weight = jax.random.uniform(k5, (n,), jnp.float32, 0.0, 2.0)

    # log / mean, no weights
    loss_log = IoULoss(mode="log", reduction="mean", loss_weight=1.0)
    out1 = jax.block_until_ready(loss_log(pred, target))
    ref1 = _reference_iou_loss(pred, target, mode="log", reduction="mean")
    assert jnp.allclose(out1, ref1, rtol=1e-5, atol=1e-5), (out1, ref1)

    # linear / sum, weighted
    loss_lin = IoULoss(mode="linear", reduction="sum", loss_weight=1.0)
    out2 = jax.block_until_ready(loss_lin(pred, target, weight=weight))
    ref2 = _reference_iou_loss(pred, target, weight=weight, mode="linear",
                               reduction="sum")
    assert jnp.allclose(out2, ref2, rtol=1e-5, atol=1e-5), (out2, ref2)

    # square / none (per-box)
    loss_sq = IoULoss(mode="square", reduction="none", loss_weight=2.0)
    out3 = jax.block_until_ready(loss_sq(pred, target))
    ref3 = 2.0 * _reference_iou_loss(pred, target, mode="square",
                                     reduction="none")
    assert jnp.allclose(out3, ref3, rtol=1e-5, atol=1e-5), (out3, ref3)

    print("KERNEL_OK")
</pallas_src>

<mosaic_0001>
module attributes {stable_mosaic.version = 11 : i64} {
  func.func @_iou_loss_kernel(%arg0: i32, %arg1: memref<8x128xf32, #tpu.memory_space<vmem>>, %arg2: memref<1x128xf32, #tpu.memory_space<vmem>>, %arg3: memref<1x128xf32, #tpu.memory_space<vmem>>) attributes {dimension_semantics = [#tpu.dimension_semantics<parallel>], iteration_bounds = array<i64: 1>, scalar_prefetch = 0 : i64, scratch_operands = 0 : i64, tpu.core_type = #tpu.core_type<tc>, window_params = [{transform_indices = @transform_0, window_bounds = array<i64: 8, 128>}, {transform_indices = @transform_1, window_bounds = array<i64: 1, 128>}, {transform_indices = @transform_2, window_bounds = array<i64: 1, 128>}]} {
    %c0 = arith.constant 0 : index
    %c0_0 = arith.constant 0 : index
    %0 = vector.load %arg1[%c0, %c0_0] : memref<8x128xf32, #tpu.memory_space<vmem>>, vector<1x128xf32>
    %c1 = arith.constant 1 : index
    %c0_1 = arith.constant 0 : index
    %1 = vector.load %arg1[%c1, %c0_1] : memref<8x128xf32, #tpu.memory_space<vmem>>, vector<1x128xf32>
    %c2 = arith.constant 2 : index
    %c0_2 = arith.constant 0 : index
    %2 = vector.load %arg1[%c2, %c0_2] : memref<8x128xf32, #tpu.memory_space<vmem>>, vector<1x128xf32>
    %c3 = arith.constant 3 : index
    %c0_3 = arith.constant 0 : index
    %3 = vector.load %arg1[%c3, %c0_3] : memref<8x128xf32, #tpu.memory_space<vmem>>, vector<1x128xf32>
    %c4 = arith.constant 4 : index
    %c0_4 = arith.constant 0 : index
    %4 = vector.load %arg1[%c4, %c0_4] : memref<8x128xf32, #tpu.memory_space<vmem>>, vector<1x128xf32>
    %c5 = arith.constant 5 : index
    %c0_5 = arith.constant 0 : index
    %5 = vector.load %arg1[%c5, %c0_5] : memref<8x128xf32, #tpu.memory_space<vmem>>, vector<1x128xf32>
    %c6 = arith.constant 6 : index
    %c0_6 = arith.constant 0 : index
    %6 = vector.load %arg1[%c6, %c0_6] : memref<8x128xf32, #tpu.memory_space<vmem>>, vector<1x128xf32>
    %c7 = arith.constant 7 : index
    %c0_7 = arith.constant 0 : index
    %7 = vector.load %arg1[%c7, %c0_7] : memref<8x128xf32, #tpu.memory_space<vmem>>, vector<1x128xf32>
    %8 = arith.subf %2, %0 : vector<1x128xf32>
    %9 = arith.subf %3, %1 : vector<1x128xf32>
    %10 = arith.mulf %8, %9 : vector<1x128xf32>
    %11 = arith.subf %6, %4 : vector<1x128xf32>
    %12 = arith.subf %7, %5 : vector<1x128xf32>
    %13 = arith.mulf %11, %12 : vector<1x128xf32>
    %14 = arith.minimumf %2, %6 : vector<1x128xf32>
    %15 = arith.maximumf %0, %4 : vector<1x128xf32>
    %16 = arith.subf %14, %15 : vector<1x128xf32>
    %cst = arith.constant 0.000000e+00 : f32
    %17 = vector.broadcast %cst : f32 to vector<1x128xf32>
    %18 = arith.maximumf %16, %17 : vector<1x128xf32>
    %19 = arith.minimumf %3, %7 : vector<1x128xf32>
    %20 = arith.maximumf %1, %5 : vector<1x128xf32>
    %21 = arith.subf %19, %20 : vector<1x128xf32>
    %cst_8 = arith.constant 0.000000e+00 : f32
    %22 = vector.broadcast %cst_8 : f32 to vector<1x128xf32>
    %23 = arith.maximumf %21, %22 : vector<1x128xf32>
    %24 = arith.mulf %18, %23 : vector<1x128xf32>
    %25 = arith.addf %10, %13 : vector<1x128xf32>
    %26 = arith.subf %25, %24 : vector<1x128xf32>
    %cst_9 = arith.constant 9.99999997E-7 : f32
    %27 = vector.broadcast %cst_9 : f32 to vector<1x128xf32>
    %28 = arith.maximumf %26, %27 : vector<1x128xf32>
    %29 = arith.divf %24, %28 : vector<1x128xf32>
    %cst_10 = arith.constant 9.99999997E-7 : f32
    %30 = vector.broadcast %cst_10 : f32 to vector<1x128xf32>
    %31 = arith.maximumf %29, %30 : vector<1x128xf32>
    %32 = math.log %31 : vector<1x128xf32>
    %cst_11 = arith.constant 0.000000e+00 : f32
    %33 = vector.broadcast %cst_11 : f32 to vector<1x128xf32>
    %34 = arith.subf %33, %32 : vector<1x128xf32>
    %c0_12 = arith.constant 0 : index
    %c0_13 = arith.constant 0 : index
    %35 = vector.load %arg2[%c0_12, %c0_13] : memref<1x128xf32, #tpu.memory_space<vmem>>, vector<1x128xf32>
    %36 = arith.mulf %34, %35 : vector<1x128xf32>
    %c0_14 = arith.constant 0 : index
    %c0_15 = arith.constant 0 : index
    %37 = vector.load %arg3[%c0_14, %c0_15] : memref<1x128xf32, #tpu.memory_space<vmem>>, vector<1x128xf32>
    tpu.vector_store %arg3[%c0_14, %c0_15], %36 {strides = array<i32>} : memref<1x128xf32, #tpu.memory_space<vmem>>, vector<1x128xf32>,
    return
  }
  func.func @transform_0(%arg0: i32) -> (i32, i32) {
    %c0_i32 = arith.constant 0 : i32
    %c0_i32_0 = arith.constant 0 : i32
    return %c0_i32, %arg0 : i32, i32
  }
  func.func @transform_1(%arg0: i32) -> (i32, i32) {
    %c0_i32 = arith.constant 0 : i32
    %c0_i32_0 = arith.constant 0 : i32
    return %c0_i32, %arg0 : i32, i32
  }
  func.func @transform_2(%arg0: i32) -> (i32, i32) {
    %c0_i32 = arith.constant 0 : i32
    %c0_i32_0 = arith.constant 0 : i32
    return %c0_i32, %arg0 : i32, i32
  }
}

</mosaic_0001>

<bundles_post_ra>
// kernel: _iou_loss_per_box.1
= control target key start
LH: loop header
LB: loop body
LE: loop exit
PB: predicated region body
PF: predicated region fallthrough
CT: control target
= control target key end

     0   :  { %s112_s0 = inlined_call_operand.vmem [shape: f32[8,128], index: 0, kind: input, shape index: {}]   ;;  %s113_s1 = inlined_call_operand.vmem [shape: f32[1,128], index: 1, kind: input, shape index: {}]   ;;  %s114_s2 = inlined_call_operand.vmem [shape: f32[1,128], index: 2, kind: output, shape index: {}]  }
   0x1   :  { %v11_v0 = vld [vmem:[%s112_s0] sm:$0x1]  ;;  %v12_v1 = vld [vmem:[%s112_s0 + $0x1] sm:$0x1]  ;;  %v13_v2 = vld [vmem:[%s112_s0 + $0x2] sm:$0x1] }
   0x2   :  { %v14_v3 = vld [vmem:[%s112_s0 + $0x3] sm:$0x1]  ;;  %v15_v4 = vld [vmem:[%s112_s0 + $0x4] sm:$0x1]  ;;  %v16_v5 = vld [vmem:[%s112_s0 + $0x5] sm:$0x1]  ;;  %v19_v6 = vsub.f32 %v13_v2, %v11_v0 }
   0x3   :  { %v17_v7 = vld [vmem:[%s112_s0 + $0x6] sm:$0x1]  ;;  %v18_v8 = vld [vmem:[%s112_s0 + $0x7] sm:$0x1]  ;;  %v20_v9 = vsub.f32 %v14_v3, %v12_v1  ;;  %v26_v10 = vmax.f32 %v11_v0, %v15_v4  ;;  %v30_v11 = vmax.f32 %v12_v1, %v16_v5  ;;  %v56_v40 = vld [vmem:[%s113_s1] sm:$0x1] }
   0x4   :  { %v22_v12 = vsub.f32 %v17_v7, %v15_v4  ;;  %v23_v13 = vsub.f32 %v18_v8, %v16_v5  ;;  %v25_v14 = vmin.f32 %v13_v2, %v17_v7  ;;  %v29_v15 = vmin.f32 %v14_v3, %v18_v8 }
   0x5   :  { %v21_v16 = vmul.f32 %v20_v9, %v19_v6 }
   0x6   :  { %v24_v17 = vmul.f32 %v23_v13, %v22_v12  ;;  %v27_v18 = vsub.f32 %v25_v14, %v26_v10  ;;  %v31_v19 = vsub.f32 %v29_v15, %v30_v11 }
   0x8   :  { %v28_v20 = vmax.f32 %v27_v18, 0.0  ;;  %v32_v21 = vmax.f32 %v31_v19, 0.0  ;;  %v34_v22 = vadd.f32 %v24_v17, %v21_v16 }
   0xa   :  { %v33_v23 = vmul.f32 %v32_v21, %v28_v20 }
   0xc   :  { %v35_v24 = vsub.f32 %v34_v22, %v33_v23 }
   0xe   :  { %v36_v25 = vmax.f32 %v35_v24, 1e-06 }
  0x10   :  { %63 = vrcp.f32 %v36_v25  ;;  %v48_v28 = vand.u32 2147483648, %v36_v25  ;;  %vm42_vm0 = vweird.f32 %v36_v25  ;;  %v46_v30 = vand.u32 2147483647, %v36_v25 }
  0x12   :  { %v49_v32 = vor.u32 1.1754944e-38, %v48_v28  ;;  %vm47_vm3 = vcmp.eq.f32.partialorder %v46_v30, 8.507059e+37 }
  0x16   :  { %v64_v26 = vpop.eup %63 }
  0x17   :  { %v38_v27 = vmul.f32 %v64_v26, %v36_v25  ;;  %vm43_vm1 = vweird.f32 %v64_v26 }
  0x18   :  { %vm44_vm2 = vmor %vm42_vm0, %vm43_vm1 }
  0x19   :  { %v39_v29 = vsub.f32 1.0, %v38_v27 }
  0x1b   :  { %v40_v31 = vmul.f32 %v64_v26, %v39_v29 }
  0x1d   :  { %v41_v33 = vadd.f32 %v64_v26, %v40_v31 }
  0x1f   :  { %v45_v34 = vsel %vm44_vm2, %v64_v26, %v41_v33 }
  0x20   :  { %v50_v35 = vsel %vm47_vm3, %v49_v32, %v45_v34 }
  0x21   :  { %v51_v36 = vmul.f32 %v50_v35, %v33_v23 }
  0x23   :  { %v52_v37 = vmax.f32 %v51_v36, 1e-06 }
  0x25   :  { %65 = vlog2.f32 %v52_v37 }
  0x2b   :  { %v66_v38 = vpop.eup %65 }
  0x2c   :  { %v54_v39 = vmul.f32 0.6931472, %v66_v38 }
  0x2e   :  { %v55_v41 = vsub.f32 0.0, %v54_v39 }
  0x30   :  { %v57_v42 = vmul.f32 %v56_v40, %v55_v41 }
  0x32   :  { %58 = vst [vmem:[%s114_s2] sm:$0x1] %v57_v42 }

</bundles_post_ra>
